<compile_context>
chip_gen: v7x
topology: tpu7x:2x2x1
jax: 0.10.0
libtpu: 0.0.40
codegen_flags: <defaults>
</compile_context>

<pallas_src>
import functools

import numpy as np
import jax
import jax.numpy as jnp
from jax.experimental import pallas as pl
from jax.experimental.pallas import tpu as pltpu


def _round_up(x, m):
    return ((x + m - 1) // m) * m


# ----------------------------------------------------------------------------
# Kernel 1: fused softmax over classes + per-class (negated) errors / fg masks
# ----------------------------------------------------------------------------
def _softmax_errors_kernel(x_ref, labels_ref, neg_err_ref, fg_ref, *, ignore_index):
    x = x_ref[0]                                     # (C, Tp) f32 raw logits
    labels = labels_ref[0]                           # (1, Tp) i32

    # softmax over the class (sublane) axis
    m = jnp.max(x, axis=0, keepdims=True)            # (1, Tp)
    e = jnp.exp(x - m)
    probs = e / jnp.sum(e, axis=0, keepdims=True)    # (C, Tp)

    class_ids = jax.lax.broadcasted_iota(jnp.int32, x.shape, 0)   # (C, Tp)
    valid = labels != ignore_index                                # (1, Tp)
    fg = ((labels == class_ids) & valid).astype(jnp.float32)      # (C, Tp)

    # negated error: ascending sort key == descending error order.
    # ignored / padded pixels -> 0 error & 0 fg (contribute nothing downstream).
    neg_err_ref[...] = jnp.where(valid, -jnp.abs(fg - probs), 0.0)
    fg_ref[...] = fg.astype(jnp.bfloat16)            # exact 0/1 in bf16


# ----------------------------------------------------------------------------
# Kernel 2: streaming Lovasz extension over the sorted errors (carry + tri-matmul)
# ----------------------------------------------------------------------------
def _lovasz_stream_kernel(neg_err_ref, fg_ref, gts_ref, loss_ref,
                          tri_ref, carry_ref, acc_ref, *, tile):
    t = pl.program_id(0)
    f32 = jnp.float32

    @pl.when(t == 0)
    def _():
        # Build the (Tp2, Tp2) upper-triangular-ones block ONCE; reused every step.
        r = jax.lax.broadcasted_iota(jnp.int32, (tile, tile), 0)
        c = jax.lax.broadcasted_iota(jnp.int32, (tile, tile), 1)
        tri_ref[...] = (r <= c).astype(jnp.bfloat16)
        carry_ref[...] = jnp.zeros_like(carry_ref)
        acc_ref[...] = jnp.zeros_like(acc_ref)

    errors = -neg_err_ref[...]                       # (C, Tp2) f32, sorted desc
    fg_bf = fg_ref[...]                              # (C, Tp2) bf16 (0/1)
    fg = fg_bf.astype(f32)
    gts = gts_ref[...]                               # (C, 1) f32 totals

    # inclusive cumsum within the tile (MXU, exact) + running carry from prev tiles
    carry = carry_ref[...]                           # (C, 1)
    local_cum = jnp.dot(fg_bf, tri_ref[...], preferred_element_type=f32)  # (C, Tp2)
    cum_fg = carry + local_cum                       # global inclusive cumsum
    carry_ref[...] = carry + jnp.sum(fg, axis=1, keepdims=True)

    lidx = jax.lax.broadcasted_iota(jnp.int32, errors.shape, 1)
    gidx = lidx + t * tile                           # global 0-based position j
    pos = (gidx + 1).astype(f32)                     # j + 1

    # jaccard[j] = 1 - (gts - cum_fg[j]) / (gts + (j+1) - cum_fg[j])
    inter = gts - cum_fg
    union = gts + pos - cum_fg
    jacc = 1.0 - inter / union

    # jaccard[j-1] without any shift: cumsum up to j-1 == cum_fg[j] - fg[j]
    cum_prev = cum_fg - fg
    inter_p = gts - cum_prev
    union_p = gts + (pos - 1.0) - cum_prev
    is_first = gidx == 0
    union_p = jnp.where(is_first, 1.0, union_p)                    # guard 0/0 at j==0
    jacc_prev = jnp.where(is_first, 0.0, 1.0 - inter_p / union_p)  # grad[0] = jacc[0]

    grad = jacc - jacc_prev                                        # lovasz_grad
    acc_ref[...] += jnp.sum(errors * grad, axis=1, keepdims=True)  # per-class partial dot

    @pl.when(t == pl.num_programs(0) - 1)
    def _():
        present = (gts > 0.0).astype(f32)                          # classes='present'
        num = jnp.sum(acc_ref[...] * present, axis=0, keepdims=True)
        den = jnp.maximum(jnp.sum(present, axis=0, keepdims=True), 1.0)
        loss_ref[...] = num / den                                  # mean over present classes


# ----------------------------------------------------------------------------
# Wrapper
# ----------------------------------------------------------------------------
@functools.partial(jax.jit, static_argnames=("ignore_index",))
def lovasz_softmax_pallas(output, target, ignore_index=-1):
    """output: (B, C, H, W) float logits (pre-softmax); target: (B, H, W) int."""
    B, C, H, W = output.shape
    HW = H * W

    x = output.reshape(B, C, HW).astype(jnp.float32)       # free reshape, no transpose
    labels = target.reshape(B, 1, HW).astype(jnp.int32)

    # --- kernel 1: tiled over pixels, transpose fused via index maps ---------
    tp1 = 1024 if HW >= 1024 else _round_up(HW, 128)
    hw_pad = _round_up(HW, tp1)
    if hw_pad != HW:
        x = jnp.pad(x, ((0, 0), (0, 0), (0, hw_pad - HW)))
        labels = jnp.pad(labels, ((0, 0), (0, 0), (0, hw_pad - HW)),
                         constant_values=ignore_index)

    n_t1 = hw_pad // tp1
    P = B * hw_pad

    neg_err, fg = pl.pallas_call(
        functools.partial(_softmax_errors_kernel, ignore_index=ignore_index),
        grid=(B, n_t1),
        in_specs=[
            pl.BlockSpec((1, C, tp1), lambda b, t: (b, 0, t)),
            pl.BlockSpec((1, 1, tp1), lambda b, t: (b, 0, t)),
        ],
        out_specs=[
            pl.BlockSpec((C, tp1), lambda b, t: (0, b * n_t1 + t)),
            pl.BlockSpec((C, tp1), lambda b, t: (0, b * n_t1 + t)),
        ],
        out_shape=[
            jax.ShapeDtypeStruct((C, P), jnp.float32),
            jax.ShapeDtypeStruct((C, P), jnp.bfloat16),
        ],
        compiler_params=pltpu.CompilerParams(
            dimension_semantics=("parallel", "parallel"),
            vmem_limit_bytes=32 * 1024 * 1024,
        ),
    )(x, labels)

    # --- glue: gts pre-pass + one variadic key/value sort (no gathers) -------
    gts = jnp.sum(fg, axis=1, keepdims=True, dtype=jnp.float32)      # (C, 1)
    # TODO(synk): per-class descending sort has no clean in-kernel Pallas TPU
    # primitive; done with a single XLA variadic sort between the two kernels.
    neg_sorted, fg_sorted = jax.lax.sort(
        (neg_err, fg), dimension=1, num_keys=1, is_stable=False)

    # --- kernel 2: streaming reduction over sorted pixels --------------------
    tp2 = 512 if P >= 512 else _round_up(P, 128)
    p_pad = _round_up(P, tp2)
    if p_pad != P:                                   # tail pad: err=0, fg=0 (inert)
        neg_sorted = jnp.pad(neg_sorted, ((0, 0), (0, p_pad - P)))
        fg_sorted = jnp.pad(fg_sorted, ((0, 0), (0, p_pad - P)))

    loss = pl.pallas_call(
        functools.partial(_lovasz_stream_kernel, tile=tp2),
        grid=(p_pad // tp2,),
        in_specs=[
            pl.BlockSpec((C, tp2), lambda t: (0, t)),
            pl.BlockSpec((C, tp2), lambda t: (0, t)),
            pl.BlockSpec((C, 1), lambda t: (0, 0)),
        ],
        out_specs=pl.BlockSpec((1, 1), lambda t: (0, 0)),
        out_shape=jax.ShapeDtypeStruct((1, 1), jnp.float32),
        scratch_shapes=[
            pltpu.VMEM((tp2, tp2), jnp.bfloat16),    # tri block (built once)
            pltpu.VMEM((C, 1), jnp.float32),         # cumsum carry
            pltpu.VMEM((C, 1), jnp.float32),         # per-class loss accumulator
        ],
        compiler_params=pltpu.CompilerParams(
            dimension_semantics=("arbitrary",),
            vmem_limit_bytes=32 * 1024 * 1024,
        ),
    )(neg_sorted, fg_sorted, gts)

    return loss[0, 0]


# ----------------------------------------------------------------------------
# Pure-numpy reference mirroring the original PyTorch code (for validation)
# ----------------------------------------------------------------------------
def _lovasz_softmax_numpy_ref(output, target, ignore=-1):
    x = output.astype(np.float64)
    x = x - x.max(axis=1, keepdims=True)
    e = np.exp(x)
    probas = e / e.sum(axis=1, keepdims=True)
    B, C, H, W = probas.shape
    probas = np.transpose(probas, (0, 2, 3, 1)).reshape(-1, C)
    labels = target.reshape(-1)
    valid = labels != ignore
    probas = probas[valid]
    labels = labels[valid]
    losses = []
    for c in range(C):
        fg = (labels == c).astype(np.float64)
        if fg.sum() == 0:       # classes='present'
            continue
        errs = np.abs(fg - probas[:, c])
        order = np.argsort(-errs, kind="stable")
        errs_s, fg_s = errs[order], fg[order]
        gts = fg_s.sum()
        inter = gts - np.cumsum(fg_s)
        union = gts + np.cumsum(1.0 - fg_s)
        jacc = 1.0 - inter / union
        jacc[1:] = jacc[1:] - jacc[:-1]
        losses.append(float(np.dot(errs_s, jacc)))
    return float(np.mean(losses)) if losses else 0.0


if __name__ == "__main__":
    key = jax.random.PRNGKey(0)
    kx, kt = jax.random.split(key)
    B, C, H, W = 2, 4, 16, 16

    logits = jax.random.normal(kx, (B, C, H, W), dtype=jnp.float32)
    target = jax.random.randint(kt, (B, H, W), 0, C, dtype=jnp.int32)
    # exercise the ignore_index path on a few pixels
    target = target.at[0, 0, :3].set(-1)

    loss = lovasz_softmax_pallas(logits, target, ignore_index=-1)
    loss = jax.block_until_ready(loss)

    ref = _lovasz_softmax_numpy_ref(np.asarray(logits), np.asarray(target), ignore=-1)
    assert abs(float(loss) - ref) < 1e-4, (float(loss), ref)
    print("KERNEL_OK")
</pallas_src>

<mosaic_0001>
module attributes {stable_mosaic.version = 11 : i64} {
  func.func @_softmax_errors_kernel(%arg0: i32, %arg1: i32, %arg2: memref<1x4x256xf32, #tpu.memory_space<vmem>>, %arg3: memref<1x1x256xi32, #tpu.memory_space<vmem>>, %arg4: memref<4x256xf32, #tpu.memory_space<vmem>>, %arg5: memref<4x256xbf16, #tpu.memory_space<vmem>>) attributes {dimension_semantics = [#tpu.dimension_semantics<parallel>, #tpu.dimension_semantics<parallel>], iteration_bounds = array<i64: 2, 1>, scalar_prefetch = 0 : i64, scratch_operands = 0 : i64, tpu.core_type = #tpu.core_type<tc>, window_params = [{transform_indices = @transform_0, window_bounds = array<i64: 1, 4, 256>}, {transform_indices = @transform_1, window_bounds = array<i64: 1, 1, 256>}, {transform_indices = @transform_2, window_bounds = array<i64: 4, 256>}, {transform_indices = @transform_3, window_bounds = array<i64: 4, 256>}]} {
    %c0 = arith.constant 0 : index
    %c0_0 = arith.constant 0 : index
    %c0_1 = arith.constant 0 : index
    %0 = vector.load %arg2[%c0, %c0_0, %c0_1] : memref<1x4x256xf32, #tpu.memory_space<vmem>>, vector<1x4x256xf32>
    %1 = vector.shape_cast %0 : vector<1x4x256xf32> to vector<4x256xf32>
    %c0_2 = arith.constant 0 : index
    %c0_3 = arith.constant 0 : index
    %c0_4 = arith.constant 0 : index
    %2 = vector.load %arg3[%c0_2, %c0_3, %c0_4] : memref<1x1x256xi32, #tpu.memory_space<vmem>>, vector<1x1x256xi32>
    %3 = vector.shape_cast %2 : vector<1x1x256xi32> to vector<1x256xi32>
    %cst = arith.constant dense<0xFF800000> : vector<256xf32>
    %4 = vector.multi_reduction <maximumf>, %1, %cst [0] : vector<4x256xf32> to vector<256xf32>
    %5 = vector.shape_cast %4 : vector<256xf32> to vector<1x256xf32>
    %6 = vector.broadcast %5 : vector<1x256xf32> to vector<4x256xf32>
    %7 = arith.subf %1, %6 : vector<4x256xf32>
    %8 = math.exp %7 : vector<4x256xf32>
    %cst_5 = arith.constant dense<0.000000e+00> : vector<256xf32>
    %9 = vector.multi_reduction <add>, %8, %cst_5 [0] : vector<4x256xf32> to vector<256xf32>
    %10 = vector.shape_cast %9 : vector<256xf32> to vector<1x256xf32>
    %11 = vector.broadcast %10 : vector<1x256xf32> to vector<4x256xf32>
    %12 = arith.divf %8, %11 : vector<4x256xf32>
    %13 = tpu.iota {dimensions = array<i32: 0>} : vector<4x256xi32>
    %c-1_i32 = arith.constant -1 : i32
    %14 = vector.broadcast %c-1_i32 : i32 to vector<1x256xi32>
    %15 = arith.cmpi ne, %3, %14 : vector<1x256xi32>
    %16 = vector.broadcast %3 : vector<1x256xi32> to vector<4x256xi32>
    %17 = arith.cmpi eq, %16, %13 : vector<4x256xi32>
    %18 = vector.broadcast %15 : vector<1x256xi1> to vector<4x256xi1>
    %19 = arith.andi %17, %18 : vector<4x256xi1>
    %20 = arith.extui %19 : vector<4x256xi1> to vector<4x256xi32>
    %21 = arith.sitofp %20 : vector<4x256xi32> to vector<4x256xf32>
    %22 = arith.subf %21, %12 : vector<4x256xf32>
    %23 = math.absf %22 : vector<4x256xf32>
    %cst_6 = arith.constant 0.000000e+00 : f32
    %24 = vector.broadcast %cst_6 : f32 to vector<4x256xf32>
    %25 = arith.subf %24, %23 : vector<4x256xf32>
    %cst_7 = arith.constant 0.000000e+00 : f32
    %26 = vector.shape_cast %15 : vector<1x256xi1> to vector<1x256xi1>
    %27 = vector.broadcast %26 : vector<1x256xi1> to vector<4x256xi1>
    %28 = vector.broadcast %cst_7 : f32 to vector<4x256xf32>
    %29 = arith.select %27, %25, %28 : vector<4x256xi1>, vector<4x256xf32>
    %c0_8 = arith.constant 0 : index
    %c0_9 = arith.constant 0 : index
    %30 = vector.load %arg4[%c0_8, %c0_9] : memref<4x256xf32, #tpu.memory_space<vmem>>, vector<4x256xf32>
    tpu.vector_store %arg4[%c0_8, %c0_9], %29 {strides = array<i32>} : memref<4x256xf32, #tpu.memory_space<vmem>>, vector<4x256xf32>,
    %31 = arith.truncf %21 : vector<4x256xf32> to vector<4x256xbf16>
    %c0_10 = arith.constant 0 : index
    %c0_11 = arith.constant 0 : index
    %32 = vector.load %arg5[%c0_10, %c0_11] : memref<4x256xbf16, #tpu.memory_space<vmem>>, vector<4x256xbf16>
    tpu.vector_store %arg5[%c0_10, %c0_11], %31 {strides = array<i32>} : memref<4x256xbf16, #tpu.memory_space<vmem>>, vector<4x256xbf16>,
    return
  }
  func.func @transform_0(%arg0: i32, %arg1: i32) -> (i32, i32, i32) {
    %c0_i32 = arith.constant 0 : i32
    %c0_i32_0 = arith.constant 0 : i32
    return %arg0, %c0_i32, %arg1 : i32, i32, i32
  }
  func.func @transform_1(%arg0: i32, %arg1: i32) -> (i32, i32, i32) {
    %c0_i32 = arith.constant 0 : i32
    %c0_i32_0 = arith.constant 0 : i32
    return %arg0, %c0_i32, %arg1 : i32, i32, i32
  }
  func.func @transform_2(%arg0: i32, %arg1: i32) -> (i32, i32) {
    %c1_i32 = arith.constant 1 : i32
    %0 = arith.muli %arg0, %c1_i32 : i32
    %1 = arith.addi %0, %arg1 : i32
    %c0_i32 = arith.constant 0 : i32
    %c0_i32_0 = arith.constant 0 : i32
    return %c0_i32, %1 : i32, i32
  }
  func.func @transform_3(%arg0: i32, %arg1: i32) -> (i32, i32) {
    %c1_i32 = arith.constant 1 : i32
    %0 = arith.muli %arg0, %c1_i32 : i32
    %1 = arith.addi %0, %arg1 : i32
    %c0_i32 = arith.constant 0 : i32
    %c0_i32_0 = arith.constant 0 : i32
    return %c0_i32, %1 : i32, i32
  }
}

module attributes {stable_mosaic.version = 11 : i64} {
  func.func @_lovasz_stream_kernel(%arg0: i32, %arg1: memref<4x512xf32, #tpu.memory_space<vmem>>, %arg2: memref<4x512xbf16, #tpu.memory_space<vmem>>, %arg3: memref<4x1xf32, #tpu.memory_space<vmem>>, %arg4: memref<1x1xf32, #tpu.memory_space<vmem>>, %arg5: memref<512x512xbf16, #tpu.memory_space<vmem>>, %arg6: memref<4x1xf32, #tpu.memory_space<vmem>>, %arg7: memref<4x1xf32, #tpu.memory_space<vmem>>) attributes {dimension_semantics = [#tpu.dimension_semantics<arbitrary>], iteration_bounds = array<i64: 1>, scalar_prefetch = 0 : i64, scratch_operands = 3 : i64, tpu.core_type = #tpu.core_type<tc>, window_params = [{transform_indices = @transform_0, window_bounds = array<i64: 4, 512>}, {transform_indices = @transform_1, window_bounds = array<i64: 4, 512>}, {pipeline_mode = #tpu.pipeline_mode<synchronous>, transform_indices = @transform_2, window_bounds = array<i64: 4, 1>}, {pipeline_mode = #tpu.pipeline_mode<synchronous>, transform_indices = @transform_3, window_bounds = array<i64: 1, 1>}]} {
    %c0_i32 = arith.constant 0 : i32
    %0 = arith.cmpi eq, %arg0, %c0_i32 : i32
    %1 = arith.extui %0 : i1 to i32
    %c0_i32_0 = arith.constant 0 : i32
    %2 = arith.cmpi ne, %1, %c0_i32_0 : i32
    scf.if %2 {
      %60 = tpu.iota {dimensions = array<i32: 0>} : vector<512x512xi32>
      %61 = tpu.iota {dimensions = array<i32: 1>} : vector<512x512xi32>
      %62 = arith.cmpi sle, %60, %61 : vector<512x512xi32>
      %63 = arith.extui %62 : vector<512x512xi1> to vector<512x512xi32>
      %64 = arith.sitofp %63 : vector<512x512xi32> to vector<512x512xf32>
      %65 = arith.truncf %64 : vector<512x512xf32> to vector<512x512xbf16>
      %c0_27 = arith.constant 0 : index
      %c0_28 = arith.constant 0 : index
      %66 = vector.load %arg5[%c0_27, %c0_28] : memref<512x512xbf16, #tpu.memory_space<vmem>>, vector<512x512xbf16>
      tpu.vector_store %arg5[%c0_27, %c0_28], %65 {strides = array<i32>} : memref<512x512xbf16, #tpu.memory_space<vmem>>, vector<512x512xbf16>,
      %cst_29 = arith.constant 0.000000e+00 : f32
      %67 = vector.broadcast %cst_29 : f32 to vector<4x1xf32>
      %c0_30 = arith.constant 0 : index
      %c0_31 = arith.constant 0 : index
      %68 = vector.load %arg6[%c0_30, %c0_31] : memref<4x1xf32, #tpu.memory_space<vmem>>, vector<4x1xf32>
      tpu.vector_store %arg6[%c0_30, %c0_31], %67 {strides = array<i32>} : memref<4x1xf32, #tpu.memory_space<vmem>>, vector<4x1xf32>,
      %cst_32 = arith.constant 0.000000e+00 : f32
      %69 = vector.broadcast %cst_32 : f32 to vector<4x1xf32>
      %c0_33 = arith.constant 0 : index
      %c0_34 = arith.constant 0 : index
      %70 = vector.load %arg7[%c0_33, %c0_34] : memref<4x1xf32, #tpu.memory_space<vmem>>, vector<4x1xf32>
      tpu.vector_store %arg7[%c0_33, %c0_34], %69 {strides = array<i32>} : memref<4x1xf32, #tpu.memory_space<vmem>>, vector<4x1xf32>,
    } else {
    }
    %c0 = arith.constant 0 : index
    %c0_1 = arith.constant 0 : index
    %3 = vector.load %arg1[%c0, %c0_1] : memref<4x512xf32, #tpu.memory_space<vmem>>, vector<4x512xf32>
    %cst = arith.constant 0.000000e+00 : f32
    %4 = vector.broadcast %cst : f32 to vector<4x512xf32>
    %5 = arith.subf %4, %3 : vector<4x512xf32>
    %c0_2 = arith.constant 0 : index
    %c0_3 = arith.constant 0 : index
    %6 = vector.load %arg2[%c0_2, %c0_3] : memref<4x512xbf16, #tpu.memory_space<vmem>>, vector<4x512xbf16>
    %7 = arith.extf %6 : vector<4x512xbf16> to vector<4x512xf32>
    %c0_4 = arith.constant 0 : index
    %c0_5 = arith.constant 0 : index
    %8 = vector.load %arg3[%c0_4, %c0_5] : memref<4x1xf32, #tpu.memory_space<vmem>>, vector<4x1xf32>
    %c0_6 = arith.constant 0 : index
    %c0_7 = arith.constant 0 : index
    %9 = vector.load %arg6[%c0_6, %c0_7] : memref<4x1xf32, #tpu.memory_space<vmem>>, vector<4x1xf32>
    %c0_8 = arith.constant 0 : index
    %c0_9 = arith.constant 0 : index
    %10 = vector.load %arg5[%c0_8, %c0_9] : memref<512x512xbf16, #tpu.memory_space<vmem>>, vector<512x512xbf16>
    %cst_10 = arith.constant dense<0.000000e+00> : vector<4x512xf32>
    %11 = tpu.matmul %6, %10, %cst_10 {dimension_numbers = #tpu.dot_dimension_numbers<[1], [0], [0], [1], [0, 0, 1, 1], [], []>} : vector<4x512xbf16>, vector<512x512xbf16>, vector<4x512xf32> -> vector<4x512xf32>
    %12 = vector.broadcast %9 : vector<4x1xf32> to vector<4x512xf32>
    %13 = arith.addf %12, %11 : vector<4x512xf32>
    %cst_11 = arith.constant dense<0.000000e+00> : vector<4xf32>
    %14 = vector.multi_reduction <add>, %7, %cst_11 [1] : vector<4x512xf32> to vector<4xf32>
    %15 = vector.shape_cast %14 : vector<4xf32> to vector<4x1xf32>
    %16 = arith.addf %9, %15 : vector<4x1xf32>
    %c0_12 = arith.constant 0 : index
    %c0_13 = arith.constant 0 : index
    %17 = vector.load %arg6[%c0_12, %c0_13] : memref<4x1xf32, #tpu.memory_space<vmem>>, vector<4x1xf32>
    tpu.vector_store %arg6[%c0_12, %c0_13], %16 {strides = array<i32>} : memref<4x1xf32, #tpu.memory_space<vmem>>, vector<4x1xf32>,
    %18 = tpu.iota {dimensions = array<i32: 1>} : vector<4x512xi32>
    %c512_i32 = arith.constant 512 : i32
    %19 = arith.muli %arg0, %c512_i32 : i32
    %20 = vector.broadcast %19 : i32 to vector<4x512xi32>
    %21 = arith.addi %18, %20 : vector<4x512xi32>
    %c1_i32 = arith.constant 1 : i32
    %22 = vector.broadcast %c1_i32 : i32 to vector<4x512xi32>
    %23 = arith.addi %21, %22 : vector<4x512xi32>
    %24 = arith.sitofp %23 : vector<4x512xi32> to vector<4x512xf32>
    %25 = vector.broadcast %8 : vector<4x1xf32> to vector<4x512xf32>
    %26 = arith.subf %25, %13 : vector<4x512xf32>
    %27 = vector.broadcast %8 : vector<4x1xf32> to vector<4x512xf32>
    %28 = arith.addf %27, %24 : vector<4x512xf32>
    %29 = arith.subf %28, %13 : vector<4x512xf32>
    %30 = arith.divf %26, %29 : vector<4x512xf32>
    %cst_14 = arith.constant 1.000000e+00 : f32
    %31 = vector.broadcast %cst_14 : f32 to vector<4x512xf32>
    %32 = arith.subf %31, %30 : vector<4x512xf32>
    %33 = arith.subf %13, %7 : vector<4x512xf32>
    %34 = vector.broadcast %8 : vector<4x1xf32> to vector<4x512xf32>
    %35 = arith.subf %34, %33 : vector<4x512xf32>
    %cst_15 = arith.constant 1.000000e+00 : f32
    %36 = vector.broadcast %cst_15 : f32 to vector<4x512xf32>
    %37 = arith.subf %24, %36 : vector<4x512xf32>
    %38 = vector.broadcast %8 : vector<4x1xf32> to vector<4x512xf32>
    %39 = arith.addf %38, %37 : vector<4x512xf32>
    %40 = arith.subf %39, %33 : vector<4x512xf32>
    %c0_i32_16 = arith.constant 0 : i32
    %41 = vector.broadcast %c0_i32_16 : i32 to vector<4x512xi32>
    %42 = arith.cmpi eq, %21, %41 : vector<4x512xi32>
    %cst_17 = arith.constant 1.000000e+00 : f32
    %43 = vector.broadcast %cst_17 : f32 to vector<4x512xf32>
    %44 = arith.select %42, %43, %40 : vector<4x512xi1>, vector<4x512xf32>
    %45 = arith.divf %35, %44 : vector<4x512xf32>
    %cst_18 = arith.constant 1.000000e+00 : f32
    %46 = vector.broadcast %cst_18 : f32 to vector<4x512xf32>
    %47 = arith.subf %46, %45 : vector<4x512xf32>
    %cst_19 = arith.constant 0.000000e+00 : f32
    %48 = vector.broadcast %cst_19 : f32 to vector<4x512xf32>
    %49 = arith.select %42, %48, %47 : vector<4x512xi1>, vector<4x512xf32>
    %50 = arith.subf %32, %49 : vector<4x512xf32>
    %c0_20 = arith.constant 0 : index
    %c0_21 = arith.constant 0 : index
    %51 = vector.load %arg7[%c0_20, %c0_21] : memref<4x1xf32, #tpu.memory_space<vmem>>, vector<4x1xf32>
    %52 = arith.mulf %5, %50 : vector<4x512xf32>
    %cst_22 = arith.constant dense<0.000000e+00> : vector<4xf32>
    %53 = vector.multi_reduction <add>, %52, %cst_22 [1] : vector<4x512xf32> to vector<4xf32>
    %54 = vector.shape_cast %53 : vector<4xf32> to vector<4x1xf32>
    %55 = arith.addf %51, %54 : vector<4x1xf32>
    %c0_23 = arith.constant 0 : index
    %c0_24 = arith.constant 0 : index
    %56 = vector.load %arg7[%c0_23, %c0_24] : memref<4x1xf32, #tpu.memory_space<vmem>>, vector<4x1xf32>
    tpu.vector_store %arg7[%c0_23, %c0_24], %55 {strides = array<i32>} : memref<4x1xf32, #tpu.memory_space<vmem>>, vector<4x1xf32>,
    %c0_i32_25 = arith.constant 0 : i32
    %57 = arith.cmpi eq, %arg0, %c0_i32_25 : i32
    %58 = arith.extui %57 : i1 to i32
    %c0_i32_26 = arith.constant 0 : i32
    %59 = arith.cmpi ne, %58, %c0_i32_26 : i32
    scf.if %59 {
      %cst_27 = arith.constant 0.000000e+00 : f32
      %60 = vector.broadcast %cst_27 : f32 to vector<4x1xf32>
      %61 = arith.cmpf ogt, %8, %60 : vector<4x1xf32>
      %62 = arith.extui %61 : vector<4x1xi1> to vector<4x1xi32>
      %63 = arith.sitofp %62 : vector<4x1xi32> to vector<4x1xf32>
      %c0_28 = arith.constant 0 : index
      %c0_29 = arith.constant 0 : index
      %64 = vector.load %arg7[%c0_28, %c0_29] : memref<4x1xf32, #tpu.memory_space<vmem>>, vector<4x1xf32>
      %65 = arith.mulf %64, %63 : vector<4x1xf32>
      %cst_30 = arith.constant dense<0.000000e+00> : vector<1xf32>
      %66 = vector.multi_reduction <add>, %65, %cst_30 [0] : vector<4x1xf32> to vector<1xf32>
      %67 = vector.shape_cast %66 : vector<1xf32> to vector<1x1xf32>
      %cst_31 = arith.constant dense<0.000000e+00> : vector<1xf32>
      %68 = vector.multi_reduction <add>, %63, %cst_31 [0] : vector<4x1xf32> to vector<1xf32>
      %69 = vector.shape_cast %68 : vector<1xf32> to vector<1x1xf32>
      %cst_32 = arith.constant 1.000000e+00 : f32
      %70 = vector.broadcast %cst_32 : f32 to vector<1x1xf32>
      %71 = arith.maximumf %69, %70 : vector<1x1xf32>
      %72 = arith.divf %67, %71 : vector<1x1xf32>
      %c0_33 = arith.constant 0 : index
      %c0_34 = arith.constant 0 : index
      %73 = vector.load %arg4[%c0_33, %c0_34] : memref<1x1xf32, #tpu.memory_space<vmem>>, vector<1x1xf32>
      tpu.vector_store %arg4[%c0_33, %c0_34], %72 {strides = array<i32>} : memref<1x1xf32, #tpu.memory_space<vmem>>, vector<1x1xf32>,
    } else {
    }
    return
  }
  func.func @transform_0(%arg0: i32) -> (i32, i32) {
    %c0_i32 = arith.constant 0 : i32
    %c0_i32_0 = arith.constant 0 : i32
    return %c0_i32, %arg0 : i32, i32
  }
  func.func @transform_1(%arg0: i32) -> (i32, i32) {
    %c0_i32 = arith.constant 0 : i32
    %c0_i32_0 = arith.constant 0 : i32
    return %c0_i32, %arg0 : i32, i32
  }
  func.func @transform_2(%arg0: i32) -> (i32, i32) {
    %c0_i32 = arith.constant 0 : i32
    %c0_i32_0 = arith.constant 0 : i32
    %c0_i32_1 = arith.constant 0 : i32
    return %c0_i32, %c0_i32_0 : i32, i32
  }
  func.func @transform_3(%arg0: i32) -> (i32, i32) {
    %c0_i32 = arith.constant 0 : i32
    %c0_i32_0 = arith.constant 0 : i32
    %c0_i32_1 = arith.constant 0 : i32
    return %c0_i32, %c0_i32_0 : i32, i32
  }
}

</mosaic_0001>

<bundles_post_ra>
// kernel: lovasz_softmax_pallas.2
= control target key start
LH: loop header
LB: loop body
LE: loop exit
PB: predicated region body
PF: predicated region fallthrough
CT: control target
= control target key end

     0   :  { %s589_s12 = smov 0   ;;  %s591_s13 = smov 0   ;;  %s640_s0 = inlined_call_operand.vmem [shape: f32[2,4,256], index: 0, kind: input, shape index: {}]   ;;  %s641_s1 = inlined_call_operand.vmem [shape: s32[2,1,256], index: 1, kind: input, shape index: {}]   ;;  %s642_s2 = inlined_call_operand.vmem [shape: f32[4,512], index: 2, kind: output, shape index: {0}]   ;;  %s643_s3 = inlined_call_operand.vmem [shape: bf16[4,512], index: 3, kind: output, shape index: {1}]  }
   0x1   :  { %s593_s14 = smov 0  }
   0x2 LB: > { %s26_s15 = sadd.s32 1, %s561_s13  ;;  %p497_p0 = scmp.ge.s32.totalorder %s565_s14, 1  ;;  %s565_s14 = sphi %s593_s14, %s14_s14   ;;  %s561_s13 = sphi %s591_s13, %s645_s13   ;;  %s557_s12 = sphi %s589_s12, %s644_s12  }
   0x3   : > { %p28_p1 = scmp.ge.s32.totalorder %s26_s15, 2  ;;  %p179_p2 = scmp.lt.s32.totalorder %s565_s14, 3 }
   0x5   : > { %s647_s15 = smov (%p28_p1, %s26_s15), 0  ;;  %p180_p3 = pnand %p497_p0, %p179_p2 }
   0x6   : > { %p223_p4 = scmp.lt.s32.totalorder (!%p180_p3), %s557_s12, 1  ;;  %s501_s16 = sshll.u32 (!%p180_p3), %s557_s12, 1  ;;  %v307_v0 = vlaneseq (!%p180_p3)  ;;  %vm262_vm0 = vcmask (!%p180_p3), 1043456   ;;  %v567_v11 = vmov (!%p180_p3), 0   ;;  %v568_v22 = vmov (!%p180_p3), 0.0  }
   0x7   : > { %183 = sbr.rel (%p180_p3) target bundleno = 93 (0x5d), region = 28  ;;  %p243_p5 = scmp.lt.s32.totalorder (!%p180_p3), %s501_s16, 3 }
   0x8   : > { %v308_v1 = vshrl.u32 (!%p180_p3), %v307_v0, 7 }
   0xa   : > { %v312_v2 = vsub.s32 (!%p180_p3), 0, %v308_v1  ;;  %v316_v3 = vsub.s32 (!%p180_p3), 1, %v308_v1 }
   0xe   : > { %s649_s12 = smov (!%p223_p4, %s557_s12), 1  ;;  %s651_s16 = smov (!%p243_p5, %s501_s16), 3 }
   0xf   : > { %s511_s17 = sshll.u32 %s649_s12, 3  ;;  %s500_s18 = sshll.u32 %s649_s12, 1 }
  0x10   : > { %s230_s21 = scalar_lea.vmem %s640_s0, %s511_s17  ;;  %s239_s24 = scalar_lea.vmem %s641_s1, %s500_s18 }
  0x11   : > { %v257_v4 = vld [vmem:[%s230_s21] sm:$0xff]  ;;  %s504_s25 = sshll.u32 %s651_s16, 1  ;;  %s502_s29 = sshll.u32 %s651_s16, 2 }
  0x12   : > { %v258_v5 = vld [vmem:[%s239_s24] sm:$0x3]  ;;  %v260_v6 = vcombine.high %v257_v4, %v257_v4  ;;  %v263_v7 = vsel %vm262_vm0, %v257_v4, -inf  ;;  %s254_s28 = scalar_lea.vmem %s643_s3, %s504_s25  ;;  %s246_s5 = scalar_lea.vmem %s642_s2, %s502_s29 }
  0x13   : > { %vm309_vm1 = vcmp.ne.s32.totalorder %v258_v5, 4294967295  ;;  %v313_v8 = vrot.slane %v258_v5, %v312_v2  ;;  %v264_v9 = vrot.slane %v263_v7, 4  ;;  %v317_v10 = vrot.slane %v258_v5, %v316_v3 }
  0x14   : > { %v320_v12 = vsel %vm309_vm1, 1, %v567_v11  ;;  %v270_v13 = vsel %vm262_vm0, %v260_v6, -inf }
  0x15   : > { %vm318_vm2 = vcmp.eq.s32.totalorder %v313_v8, %v308_v1  ;;  %v324_v14 = vrot.slane %v320_v12, %v312_v2  ;;  %v328_v15 = vrot.slane %v320_v12, %v316_v3  ;;  %v265_v16 = vmax.f32 %v263_v7, %v264_v9 }
  0x16   : > { %v271_v17 = vrot.slane %v270_v13, 4  ;;  %vm319_vm3 = vcmp.eq.s32.totalorder %v317_v10, %v308_v1 }
  0x17   : > { %vm329_vm4 = vcmp.eq.s32.totalorder %v324_v14, 1  ;;  %vm330_vm5 = vcmp.eq.s32.totalorder %v328_v15, 1  ;;  %v266_v18 = vrot.slane %v265_v16, 2 }
  0x18   : > { %v272_v19 = vmax.f32 %v270_v13, %v271_v17  ;;  %vm331_vm6 = vmand %vm318_vm2, %vm329_vm4 }
  0x19   : > { %vm332_vm7 = vmand %vm319_vm3, %vm330_vm5  ;;  %v267_v20 = vmax.f32 %v265_v16, %v266_v18  ;;  %v505_v23 = vsel %vm331_vm6, 1.0, %v568_v22 }
  0x1a   : > { %v273_v21 = vrot.slane %v272_v19, 2  ;;  %v506_v24 = vsel %vm332_vm7, 1.0, %v568_v22 }
  0x1b   : > { %v507_v25 = vpack.c.bf16 %v506_v24, %v505_v23  ;;  %v268_v26 = vrot.slane %v267_v20, 1 }
  0x1c   : > { %v274_v27 = vmax.f32 %v272_v19, %v273_v21 }
  0x1d   : > { %508 = vst.sshfl [vmem:[%s254_s28] sm:$0x33 pattern:$0x76325410] %v507_v25  ;;  %v269_v28 = vmax.f32 %v267_v20, %v268_v26 }
  0x1e   : > { %v275_v29 = vrot.slane %v274_v27, 1 }
  0x20   : > { %v276_v30 = vmax.f32 %v274_v27, %v275_v29 }
  0x22   : > { %v279_v31 = vcombine.low %v269_v28, %v276_v30 }
  0x24   : > { %v281_v32 = vsub.f32 %v257_v4, %v279_v31 }
  0x26   : > { %v282_v33 = vmul.f32 1.442695, %v281_v32 }
  0x28   : > { %539 = vpow2.f32 %v282_v33 }
  0x32   : > { %v540_v34 = vpop.eup %539 }
  0x33   : > { %v285_v35 = vcombine.high %v540_v34, %v540_v34  ;;  %v287_v36 = vsel %vm262_vm0, %v540_v34, 0.0 }
  0x34   : > { %v288_v37 = vrot.slane %v287_v36, 4 }
  0x35   : > { %v294_v38 = vsel %vm262_vm0, %v285_v35, 0.0 }
  0x36   : > { %v289_v39 = vadd.f32 %v288_v37, %v287_v36  ;;  %v295_v40 = vrot.slane %v294_v38, 4 }
  0x38   : > { %v290_v41 = vrot.slane %v289_v39, 2  ;;  %v296_v42 = vadd.f32 %v295_v40, %v294_v38 }
  0x3a   : > { %v291_v43 = vadd.f32 %v290_v41, %v289_v39  ;;  %v297_v44 = vrot.slane %v296_v42, 2 }
  0x3c   : > { %v292_v45 = vrot.slane %v291_v43, 1  ;;  %v298_v46 = vadd.f32 %v297_v44, %v296_v42 }
  0x3e   : > { %v293_v47 = vadd.f32 %v292_v45, %v291_v43  ;;  %v299_v48 = vrot.slane %v298_v46, 1 }
  0x40   : > { %v300_v49 = vadd.f32 %v299_v48, %v298_v46 }
  0x42   : > { %v303_v50 = vcombine.low %v293_v47, %v300_v49 }
  0x44   : > { %541 = vrcp.f32 %v303_v50 }
  0x4e   : > { %v542_v51 = vpop.eup %541 }
  0x4f   : > { %v306_v52 = vmul.f32 %v542_v51, %v540_v34 }
  0x51   : > { %v338_v53 = vcombine.high %v306_v52, %v306_v52  ;;  %v340_v54 = vsub.f32 %v505_v23, %v306_v52 }
  0x53   : > { %v341_v55 = vsub.f32 %v506_v24, %v338_v53  ;;  %v342_v56 = vand.u32 2147483647, %v340_v54 }
  0x55   : > { %v343_v57 = vand.u32 2147483647, %v341_v55  ;;  %v344_v58 = vsub.f32 0.0, %v342_v56 }
  0x57   : > { %v345_v59 = vsub.f32 0.0, %v343_v57  ;;  %v346_v60 = vsel %vm329_vm4, %v344_v58, 0.0 }
  0x59   : > { %v347_v61 = vsel %vm330_vm5, %v345_v59, 0.0 }
  0x5a   : > { %v350_v62 = vcombine.low %v346_v60, %v347_v61 }
  0x5c   : > { %352 = vst [vmem:[%s246_s5] sm:$0xff] %v350_v62 }
  0x5d PF: > { %s14_s14 = sadd.s32 1, %s565_s14   ;;  %s644_s12 = smov %s561_s13 }
  0x5e   : > { %p11_p6 = scmp.ge.s32.totalorder %s14_s14, 4   ;;  %s645_s13 = smov %s647_s15 }
  0x60   :  { %13 = sbr.rel (!%p11_p6) target bundleno = 2 (0x2), region = 73 }

// kernel: lovasz_softmax_pallas.3
= control target key start
LH: loop header
LB: loop body
LE: loop exit
PB: predicated region body
PF: predicated region fallthrough
CT: control target
= control target key end

     0   :  { %v19_v0 = vlaneseq  ;;  %v1815_v1 = vmov 1.0|1.0   ;;  %v1816_v2 = vmov 0.0|0.0   ;;  %s2193_s0 = inlined_call_operand.vmem [shape: f32[4,512], index: 0, kind: input, shape index: {}]   ;;  %s2194_s1 = inlined_call_operand.vmem [shape: bf16[4,512], index: 1, kind: input, shape index: {}]   ;;  %s2195_s2 = inlined_call_operand.vmem [shape: f32[4,1], index: 2, kind: input, shape index: {}]   ;;  %s2196_s3 = inlined_call_operand.hbm [shape: f32[1,1], index: 3, kind: output, shape index: {}]  }
   0x1   :  { %1275 = vmatprep.subr.bf16.mxu0 %v1815_v1  ;;  %1316 = vmatprep.subr.bf16.mxu1 %v1816_v2 }
   0x2   :  { %8 = vsyncpa [#allocation6], 0  ;;  %v1843_v3 = vshrl.u32 %v19_v0, 7  ;;  %v1845_v4 = vand.u32 127, %v19_v0  ;;  %1317 = vmatpush1.bf16.msra.mxu1 %v1816_v2  ;;  %v1817_v12 = vmov 1983009808  }
   0x3   :  { %1357 = vmatprep.subr.bf16.mxu1 %v1815_v1  ;;  %v1256_v13 = vunpack.c.l.s4 %v1817_v12  ;;  %v1874_v16 = vld [vmem:[%s2194_s1] sm:$0xff]  ;;  %v1818_v39 = vmov 0   ;;  %v1819_v40 = vmov 0.0  }
   0x4   :  { %v21_v5 = vadd.s32 8, %v1843_v3  ;;  %vm89_vm0 = vcmp.le.s32.totalorder %v1843_v3, %v1845_v4  ;;  %v22_v6 = vadd.s32 16, %v1843_v3  ;;  %v23_v7 = vadd.s32 24, %v1843_v3  ;;  %v1123_v37 = vld [vmem:[%s2195_s2] sm:$0xf]  ;;  %1771 = vset.pattern.permute.xlu0 %v1818_v39 }
   0x5   :  { %v24_v8 = vadd.s32 32, %v1843_v3  ;;  %v25_v9 = vadd.s32 40, %v1843_v3  ;;  %v26_v10 = vadd.s32 48, %v1843_v3  ;;  %v27_v11 = vadd.s32 56, %v1843_v3 }
   0x6   :  { %vm93_vm1 = vcmp.le.s32.totalorder %v21_v5, %v1845_v4  ;;  %vm97_vm2 = vcmp.le.s32.totalorder %v22_v6, %v1845_v4  ;;  %vm101_vm3 = vcmp.le.s32.totalorder %v23_v7, %v1845_v4  ;;  %v28_v14 = vadd.s32 64, %v1843_v3 }
   0x7   :  { %vm1701_vm4 = vmpackc.low %vm93_vm1, %vm89_vm0  ;;  %vm105_vm6 = vcmp.le.s32.totalorder %v24_v8, %v1845_v4  ;;  %vm109_vm7 = vcmp.le.s32.totalorder %v25_v9, %v1845_v4  ;;  %vm113_vm9 = vcmp.le.s32.totalorder %v26_v10, %v1845_v4  ;;  %vm117_vm10 = vcmp.le.s32.totalorder %v27_v11, %v1845_v4 }
   0x8   :  { %1702 = vmatpush1.bf16.msk.msra.mxu0 %vm1701_vm4, %v1815_v1  ;;  %vm1703_vm5 = vmpackc.low %vm101_vm3, %vm97_vm2  ;;  %v29_v15 = vadd.s32 72, %v1843_v3  ;;  %v1257_v17 = vunpack.c.0.s8 %v1256_v13  ;;  %v1254_v18 = vcombine.high %v1874_v16, %v1874_v16  ;;  %vm121_vm12 = vcmp.le.s32.totalorder %v28_v14, %v1845_v4 }
   0x9   :  { %1277 = vmatprep.subr.bf16.mxu0 %v1815_v1  ;;  %vm1705_vm8 = vmpackc.low %vm109_vm7, %vm105_vm6  ;;  %v30_v19 = vadd.s32 80, %v1843_v3  ;;  %v31_v20 = vadd.s32 88, %v1843_v3  ;;  %v32_v22 = vadd.s32 96, %v1843_v3  ;;  %v33_v23 = vadd.s32 104, %v1843_v3 }
   0xa   :  { %vm1707_vm11 = vmpackc.low %vm117_vm10, %vm113_vm9  ;;  %vm125_vm13 = vcmp.le.s32.totalorder %v29_v15, %v1845_v4  ;;  %v1260_v21 = vsub.s32 %v1257_v17, %v1843_v3  ;;  %v34_v28 = vadd.s32 112, %v1843_v3  ;;  %v35_v29 = vadd.s32 120, %v1843_v3 }
   0xb   :  { %vm1709_vm14 = vmpackc.low %vm125_vm13, %vm121_vm12  ;;  %vm129_vm15 = vcmp.le.s32.totalorder %v30_v19, %v1845_v4  ;;  %vm133_vm0 = vcmp.le.s32.totalorder %v31_v20, %v1845_v4  ;;  %vm137_vm2 = vcmp.le.s32.totalorder %v32_v22, %v1845_v4  ;;  %vm141_vm3 = vcmp.le.s32.totalorder %v33_v23, %v1845_v4 }
   0xc   :  { %1704 = vmatpush1.bf16.msk.msra.mxu0 %vm1703_vm5, %v1815_v1  ;;  %v1891_v24 = vrot.slane %v1254_v18, %v1260_v21  ;;  %v1894_v25 = vrot.slane %v1874_v16, %v1260_v21  ;;  %vm1711_vm1 = vmpackc.low %vm133_vm0, %vm129_vm15  ;;  %v36_v30 = vadd.s32 128, %v1843_v3  ;;  %v37_v31 = vadd.s32 136, %v1843_v3 }
   0xd   :  { %1279 = vmatprep.subr.bf16.mxu0 %v1815_v1  ;;  %v1912_v32 = vadd.s32 128, %v1845_v4  ;;  %vm1713_vm4 = vmpackc.low %vm141_vm3, %vm137_vm2  ;;  %vm145_vm5 = vcmp.le.s32.totalorder %v34_v28, %v1845_v4  ;;  %vm149_vm6 = vcmp.le.s32.totalorder %v35_v29, %v1845_v4  ;;  %v38_v33 = vadd.s32 144, %v1843_v3 }
   0xe   :  { %v1899_v26 = vcombine.high %v1891_v24, %v1891_v24  ;;  %v1269_v27 = vcombine.high %v1894_v25, %v1894_v25  ;;  %v39_v34 = vadd.s32 152, %v1843_v3  ;;  %vm1715_vm9 = vmpackc.low %vm149_vm6, %vm145_vm5  ;;  %v40_v35 = vadd.s32 160, %v1843_v3 }
   0xf   :  { %vm154_vm7 = vcmp.le.s32.totalorder %v36_v30, %v1912_v32  ;;  %v41_v36 = vadd.s32 168, %v1843_v3  ;;  %vm1113_vm13 = vcmask 3072   ;;  %v42_v38 = vadd.s32 176, %v1843_v3 }
  0x10   :  { %1706 = vmatpush1.bf16.msk.msra.mxu0 %vm1705_vm8, %v1815_v1  ;;  %1348 = vmatprep.mubr.bf16.mxu1 %v1899_v26  ;;  %vm158_vm8 = vcmp.le.s32.totalorder %v37_v31, %v1912_v32  ;;  %vm166_vm12 = vcmp.le.s32.totalorder %v39_v34, %v1912_v32  ;;  %1114 = vst.msk [vmem:[#allocation3] sm:$0xf] %vm1113_vm13, %v1819_v40  ;;  %1115 = vst.msk [vmem:[#allocation4] sm:$0xf] %vm1113_vm13, %v1819_v40  ;;  %vm1594_vm15 = vcmp.gt.f32.partialorder %v1123_v37, 0.0 }
  0x11   :  { %1281 = vmatprep.subr.bf16.mxu0 %v1815_v1  ;;  %1307 = vmatprep.mubr.bf16.mxu0 %v1269_v27  ;;  %vm1717_vm10 = vmpackc.low %vm158_vm8, %vm154_vm7  ;;  %vm170_vm0 = vcmp.le.s32.totalorder %v40_v35, %v1912_v32  ;;  %v43_v41 = vadd.s32 184, %v1843_v3  ;;  %v1946_v42 = vsel %vm1594_vm15, 1.0, %v1819_v40  ;;  %vm178_vm3 = vcmp.le.s32.totalorder %v42_v38, %v1912_v32 }
  0x12   :  { %1349 = vmatmul.mubr.bf16.vlgmr.msra.gmra.mrb[0].mxu1 %v1891_v24  ;;  %v44_v43 = vadd.s32 192, %v1843_v3  ;;  %v45_v44 = vadd.s32 200, %v1843_v3  ;;  %v46_v46 = vadd.s32 208, %v1843_v3  ;;  %v47_v47 = vadd.s32 216, %v1843_v3 }
  0x13   :  { %1358 = vmatpush1.bf16.msra.mxu1 %v1815_v1  ;;  %1389 = vmatprep.mubr.bf16.mxu1 %v1269_v27  ;;  %v48_v48 = vadd.s32 224, %v1843_v3  ;;  %v49_v49 = vadd.s32 232, %v1843_v3  ;;  %v50_v50 = vadd.s32 240, %v1843_v3  ;;  %v51_v51 = vadd.s32 248, %v1843_v3 }
  0x14   :  { %1708 = vmatpush1.bf16.msk.msra.mxu0 %vm1707_vm11, %v1815_v1  ;;  %1359 = vmatprep.subr.bf16.mxu1 %v1815_v1  ;;  %vm162_vm11 = vcmp.le.s32.totalorder %v38_v33, %v1912_v32  ;;  %vm186_vm6 = vcmp.le.s32.totalorder %v44_v43, %v1912_v32  ;;  %vm190_vm7 = vcmp.le.s32.totalorder %v45_v44, %v1912_v32  ;;  %v52_v52 = vadd.s32 256, %v1843_v3 }
  0x15   :  { %1283 = vmatprep.subr.bf16.mxu0 %v1815_v1  ;;  %vm1725_vm8 = vmpackc.low %vm190_vm7, %vm186_vm6  ;;  %v53_v53 = vadd.s32 264, %v1843_v3  ;;  %v1996_v54 = vadd.s32 256, %v1845_v4  ;;  %v54_v55 = vadd.s32 272, %v1843_v3  ;;  %v55_v56 = vadd.s32 280, %v1843_v3 }
  0x16   :  { %v56_v57 = vadd.s32 288, %v1843_v3  ;;  %v57_v58 = vadd.s32 296, %v1843_v3  ;;  %v58_v59 = vadd.s32 304, %v1843_v3  ;;  %v59_v60 = vadd.s32 312, %v1843_v3 }
  0x17   :  { %1360 = vmatpush1.bf16.msra.mxu1 %v1815_v1  ;;  %v1960_v45 = vld [vmem:[#allocation3] sm:$0xf]  ;;  %vm227_vm6 = vcmp.le.s32.totalorder %v54_v55, %v1996_v54  ;;  %vm231_vm7 = vcmp.le.s32.totalorder %v55_v56, %v1996_v54  ;;  %v60_v61 = vadd.s32 320, %v1843_v3  ;;  %v61_v62 = vadd.s32 328, %v1843_v3 }
  0x18   :  { %1710 = vmatpush1.bf16.msk.msra.mxu0 %vm1709_vm14, %v1815_v1  ;;  %1361 = vmatprep.subr.bf16.mxu1 %v1815_v1  ;;  %vm1719_vm14 = vmpackc.low %vm166_vm12, %vm162_vm11  ;;  %vm202_vm12 = vcmp.le.s32.totalorder %v48_v48, %v1912_v32  ;;  %v62_v63 = vadd.s32 336, %v1843_v3  ;;  %v63_v0 = vadd.s32 344, %v1843_v3  ;;  %v64_v5 = vadd.s32 352, %v1843_v3 }
  0x19   :  { %1285 = vmatprep.subr.bf16.mxu0 %v1815_v1  ;;  %1441 = vperm.xlu0 %1771, %v1960_v45   ;;  %v65_v6 = vadd.s32 360, %v1843_v3  ;;  %v66_v7 = vadd.s32 368, %v1843_v3  ;;  %v67_v8 = vadd.s32 376, %v1843_v3  ;;  %v68_v9 = vadd.s32 384, %v1843_v3 }
  0x1a   :  { %v69_v10 = vadd.s32 392, %v1843_v3  ;;  %v2058_v11 = vadd.s32 384, %v1845_v4  ;;  %v70_v12 = vadd.s32 400, %v1843_v3  ;;  %v71_v13 = vadd.s32 408, %v1843_v3 }
  0x1b   :  { %1362 = vmatpush1.bf16.msra.mxu1 %v1815_v1  ;;  %v72_v14 = vadd.s32 416, %v1843_v3  ;;  %v73_v15 = vadd.s32 424, %v1843_v3  ;;  %v74_v17 = vadd.s32 432, %v1843_v3  ;;  %v75_v18 = vadd.s32 440, %v1843_v3 }
  0x1c   :  { %1712 = vmatpush1.bf16.msk.msra.mxu0 %vm1711_vm1, %v1815_v1  ;;  %1363 = vmatprep.subr.bf16.mxu1 %v1815_v1  ;;  %vm174_vm1 = vcmp.le.s32.totalorder %v41_v36, %v1912_v32  ;;  %v76_v19 = vadd.s32 448, %v1843_v3  ;;  %v77_v20 = vadd.s32 456, %v1843_v3  ;;  %v78_v21 = vadd.s32 464, %v1843_v3 }
  0x1d   :  { %1287 = vmatprep.subr.bf16.mxu0 %v1815_v1  ;;  %vm1721_vm2 = vmpackc.low %vm174_vm1, %vm170_vm0  ;;  %1488 = vperm.xlu0 %1771, %v1123_v37   ;;  %vm210_vm0 = vcmp.le.s32.totalorder %v50_v50, %v1912_v32  ;;  %vm214_vm1 = vcmp.le.s32.totalorder %v51_v51, %v1912_v32  ;;  %v79_v22 = vadd.s32 472, %v1843_v3  ;;  %v80_v23 = vadd.s32 480, %v1843_v3 }
  0x1e   :  { %v83_v27 = vadd.s32 504, %v1843_v3  ;;  %v1478_v31 = vadd.s32 1, %v1845_v4  ;;  %v1479_v34 = vadd.s32 1, %v1912_v32  ;;  %v2120_v37 = vunpack.c.l.bf16 %v1874_v16 }
  0x1f   :  { %1364 = vmatpush1.bf16.msra.mxu1 %v1815_v1 }
  0x20   :  { %1714 = vmatpush1.bf16.msk.msra.mxu0 %vm1713_vm4, %v1815_v1  ;;  %1365 = vmatprep.subr.bf16.mxu1 %v1815_v1  ;;  %vm182_vm4 = vcmp.le.s32.totalorder %v43_v41, %v1912_v32  ;;  %v1482_v35 = vcvt.s32.f32 %v1478_v31  ;;  %v1483_v36 = vcvt.s32.f32 %v1479_v34  ;;  %v2127_v44 = vcombine.high %v2120_v37, %v2120_v37 }
  0x21   :  { %1289 = vmatprep.subr.bf16.mxu0 %v1815_v1  ;;  %vm1723_vm5 = vmpackc.low %vm182_vm4, %vm178_vm3  ;;  %vm219_vm3 = vcmp.le.s32.totalorder %v52_v52, %v1996_v54  ;;  %vm223_vm4 = vcmp.le.s32.totalorder %v53_v53, %v1996_v54 }
  0x23   :  { %1366 = vmatpush1.bf16.msra.mxu1 %v1815_v1 }
  0x24   :  { %1716 = vmatpush1.bf16.msk.msra.mxu0 %vm1715_vm9, %v1815_v1  ;;  %1367 = vmatprep.subr.bf16.mxu1 %v1815_v1  ;;  %vm194_vm9 = vcmp.le.s32.totalorder %v46_v46, %v1912_v32 }
  0x25   :  { %1718 = vmatprep.subr.msk.bf16.mxu0 %vm1717_vm10, %v1815_v1  ;;  %vm198_vm10 = vcmp.le.s32.totalorder %v47_v47, %v1912_v32 }
  0x26   :  { %vm1727_vm11 = vmpackc.low %vm198_vm10, %vm194_vm9  ;;  %vm235_vm9 = vcmp.le.s32.totalorder %v56_v57, %v1996_v54  ;;  %vm239_vm10 = vcmp.le.s32.totalorder %v57_v58, %v1996_v54 }
  0x27   :  { %1368 = vmatpush1.bf16.msra.mxu1 %v1815_v1 }
  0x28   :  { %1292 = vmatpush1.bf16.msra.mxu0 %v1816_v2  ;;  %1369 = vmatprep.subr.bf16.mxu1 %v1815_v1 }
  0x29   :  { %1720 = vmatprep.subr.msk.bf16.mxu0 %vm1719_vm14, %v1815_v1  ;;  %vm206_vm14 = vcmp.le.s32.totalorder %v49_v49, %v1912_v32 }
  0x2a   :  { %vm1729_vm15 = vmpackc.low %vm206_vm14, %vm202_vm12  ;;  %vm243_vm12 = vcmp.le.s32.totalorder %v58_v59, %v1996_v54  ;;  %vm247_vm14 = vcmp.le.s32.totalorder %v59_v60, %v1996_v54 }
  0x2b   :  { %1370 = vmatpush1.bf16.msra.mxu1 %v1815_v1 }
  0x2c   :  { %1294 = vmatpush1.bf16.msra.mxu0 %v1816_v2  ;;  %1371 = vmatprep.subr.bf16.mxu1 %v1815_v1 }
  0x2d   :  { %1722 = vmatprep.subr.msk.bf16.mxu0 %vm1721_vm2, %v1815_v1  ;;  %vm1731_vm2 = vmpackc.low %vm214_vm1, %vm210_vm0  ;;  %vm251_vm0 = vcmp.le.s32.totalorder %v60_v61, %v1996_v54  ;;  %vm255_vm1 = vcmp.le.s32.totalorder %v61_v62, %v1996_v54 }
  0x2f   :  { %1372 = vmatpush1.bf16.msra.mxu1 %v1815_v1 }
  0x30   :  { %1296 = vmatpush1.bf16.msra.mxu0 %v1816_v2  ;;  %1373 = vmatprep.subr.bf16.mxu1 %v1815_v1 }
  0x31   :  { %1724 = vmatprep.subr.msk.bf16.mxu0 %vm1723_vm5, %v1815_v1  ;;  %vm1733_vm5 = vmpackc.low %vm223_vm4, %vm219_vm3  ;;  %vm259_vm3 = vcmp.le.s32.totalorder %v62_v63, %v1996_v54  ;;  %vm263_vm4 = vcmp.le.s32.totalorder %v63_v0, %v1996_v54 }
  0x33   :  { %1374 = vmatpush1.bf16.msra.mxu1 %v1815_v1 }
  0x34   :  { %1298 = vmatpush1.bf16.msra.mxu0 %v1816_v2  ;;  %1375 = vmatprep.subr.bf16.mxu1 %v1815_v1 }
  0x35   :  { %1726 = vmatprep.subr.msk.bf16.mxu0 %vm1725_vm8, %v1815_v1  ;;  %vm1735_vm8 = vmpackc.low %vm231_vm7, %vm227_vm6  ;;  %vm267_vm6 = vcmp.le.s32.totalorder %v64_v5, %v1996_v54  ;;  %vm271_vm7 = vcmp.le.s32.totalorder %v65_v6, %v1996_v54 }
  0x37   :  { %1376 = vmatpush1.bf16.msra.mxu1 %v1815_v1 }
  0x38   :  { %1300 = vmatpush1.bf16.msra.mxu0 %v1816_v2  ;;  %1377 = vmatprep.subr.bf16.mxu1 %v1815_v1 }
  0x39   :  { %1728 = vmatprep.subr.msk.bf16.mxu0 %vm1727_vm11, %v1815_v1  ;;  %vm1737_vm11 = vmpackc.low %vm239_vm10, %vm235_vm9  ;;  %vm275_vm9 = vcmp.le.s32.totalorder %v66_v7, %v1996_v54  ;;  %vm279_vm10 = vcmp.le.s32.totalorder %v67_v8, %v1996_v54 }
  0x3b   :  { %1378 = vmatpush1.bf16.msra.mxu1 %v1815_v1 }
  0x3c   :  { %1302 = vmatpush1.bf16.msra.mxu0 %v1816_v2  ;;  %1379 = vmatprep.subr.bf16.mxu1 %v1815_v1 }
  0x3d   :  { %1730 = vmatprep.subr.msk.bf16.mxu0 %vm1729_vm15, %v1815_v1  ;;  %vm1739_vm15 = vmpackc.low %vm247_vm14, %vm243_vm12  ;;  %vm288_vm12 = vcmp.le.s32.totalorder %v69_v10, %v2058_v11 }
  0x3e   :  { %vm1747_vm14 = vmpackc.low %vm279_vm10, %vm275_vm9  ;;  %vm316_vm9 = vcmp.le.s32.totalorder %v76_v19, %v2058_v11  ;;  %vm320_vm10 = vcmp.le.s32.totalorder %v77_v20, %v2058_v11 }
  0x3f   :  { %1380 = vmatpush1.bf16.msra.mxu1 %v1815_v1 }
  0x40   :  { %1304 = vmatpush1.bf16.msra.mxu0 %v1816_v2  ;;  %1381 = vmatprep.subr.bf16.mxu1 %v1815_v1 }
  0x41   :  { %1732 = vmatprep.subr.msk.bf16.mxu0 %vm1731_vm2, %v1815_v1  ;;  %vm1741_vm2 = vmpackc.low %vm255_vm1, %vm251_vm0  ;;  %vm292_vm0 = vcmp.le.s32.totalorder %v70_v12, %v2058_v11  ;;  %vm296_vm1 = vcmp.le.s32.totalorder %v71_v13, %v2058_v11 }
  0x43   :  { %1382 = vmatpush1.bf16.msra.mxu1 %v1815_v1 }
  0x44   :  { %1306 = vmatpush1.bf16.msra.mxu0 %v1816_v2  ;;  %1383 = vmatprep.subr.bf16.mxu1 %v1815_v1 }
  0x45   :  { %1398 = vmatprep.subr.bf16.mxu0 %v1815_v1 }
  0x47   :  { %1308 = vmatmul.mubr.bf16.vlgmr.msra.gmra.mrb[0].mxu0 %v1894_v25  ;;  %1384 = vmatpush1.bf16.msra.mxu1 %v1815_v1 }
  0x48   :  { %1734 = vmatpush1.bf16.msk.msra.mxu0 %vm1733_vm5, %v1815_v1  ;;  %1430 = vmatprep.mubr.bf16.mxu0 %v1899_v26  ;;  %vm1743_vm5 = vmpackc.low %vm263_vm4, %vm259_vm3  ;;  %vm300_vm3 = vcmp.le.s32.totalorder %v72_v14, %v2058_v11  ;;  %vm304_vm4 = vcmp.le.s32.totalorder %v73_v15, %v2058_v11  ;;  %v82_v26 = vadd.s32 496, %v1843_v3 }
  0x49   :  { %1400 = vmatprep.subr.bf16.mxu0 %v1815_v1  ;;  %1385 = vmatprep.subr.bf16.mxu1 %v1815_v1 }
  0x4b   :  { %1386 = vmatpush1.bf16.msra.mxu1 %v1815_v1 }
  0x4c   :  { %1736 = vmatpush1.bf16.msk.msra.mxu0 %vm1735_vm8, %v1815_v1  ;;  %1387 = vmatprep.subr.bf16.mxu1 %v1815_v1  ;;  %vm1745_vm8 = vmpackc.low %vm271_vm7, %vm267_vm6  ;;  %vm308_vm6 = vcmp.le.s32.totalorder %v74_v17, %v2058_v11  ;;  %vm312_vm7 = vcmp.le.s32.totalorder %v75_v18, %v2058_v11 }
  0x4d   :  { %1402 = vmatprep.subr.bf16.mxu0 %v1815_v1 }
  0x4f   :  { %1388 = vmatpush1.bf16.msra.mxu1 %v1815_v1 }
  0x50   :  { %1738 = vmatpush1.bf16.msk.msra.mxu0 %vm1737_vm11, %v1815_v1  ;;  %vm284_vm11 = vcmp.le.s32.totalorder %v68_v9, %v2058_v11 }
  0x51   :  { %1404 = vmatprep.subr.bf16.mxu0 %v1815_v1 }
  0x52   :  { %1390 = vmatmul.mubr.bf16.vlgmr.msra.gmra.mrb[4].mxu1 %v1894_v25  ;;  %v81_v25 = vadd.s32 488, %v1843_v3 }
  0x54   :  { %1740 = vmatpush1.bf16.msk.msra.mxu0 %vm1739_vm15, %v1815_v1  ;;  %vm1749_vm15 = vmpackc.low %vm288_vm12, %vm284_vm11  ;;  %vm324_vm12 = vcmp.le.s32.totalorder %v78_v21, %v2058_v11 }
  0x55   :  { %1406 = vmatprep.subr.bf16.mxu0 %v1815_v1  ;;  %vm1757_vm11 = vmpackc.low %vm320_vm10, %vm316_vm9 }
  0x58   :  { %1742 = vmatpush1.bf16.msk.msra.mxu0 %vm1741_vm2, %v1815_v1  ;;  %vm1751_vm2 = vmpackc.low %vm296_vm1, %vm292_vm0  ;;  %vm332_vm0 = vcmp.le.s32.totalorder %v80_v23, %v2058_v11  ;;  %vm336_vm1 = vcmp.le.s32.totalorder %v81_v25, %v2058_v11 }
  0x59   :  { %1408 = vmatprep.subr.bf16.mxu0 %v1815_v1 }
  0x5c   :  { %1744 = vmatpush1.bf16.msk.msra.mxu0 %vm1743_vm5, %v1815_v1  ;;  %vm1753_vm5 = vmpackc.low %vm304_vm4, %vm300_vm3  ;;  %vm340_vm3 = vcmp.le.s32.totalorder %v82_v26, %v2058_v11  ;;  %vm344_vm4 = vcmp.le.s32.totalorder %v83_v27, %v2058_v11  ;;  %v1480_v27 = vadd.s32 1, %v1996_v54 }
  0x5d   :  { %1410 = vmatprep.subr.bf16.mxu0 %v1815_v1 }
  0x60   :  { %1746 = vmatpush1.bf16.msk.msra.mxu0 %vm1745_vm8, %v1815_v1  ;;  %vm1755_vm8 = vmpackc.low %vm312_vm7, %vm308_vm6  ;;  %vm1535_vm6 = vcmp.eq.s32.totalorder %v1845_v4, 0  ;;  %vm1454_vm7 = vcmask 1043456  }
  0x61   :  { %1412 = vmatprep.subr.bf16.mxu0 %v1815_v1 }
  0x64   :  { %1748 = vmatpush1.bf16.msk.msra.mxu0 %vm1747_vm14, %v1815_v1  ;;  %vm328_vm14 = vcmp.le.s32.totalorder %v79_v22, %v2058_v11 }
  0x65   :  { %1750 = vmatprep.subr.msk.bf16.mxu0 %vm1749_vm15, %v1815_v1  ;;  %vm1759_vm15 = vmpackc.low %vm328_vm14, %vm324_vm12 }
  0x68   :  { %1415 = vmatpush1.bf16.msra.mxu0 %v1816_v2 }
  0x69   :  { %1752 = vmatprep.subr.msk.bf16.mxu0 %vm1751_vm2, %v1815_v1  ;;  %vm1761_vm2 = vmpackc.low %vm336_vm1, %vm332_vm0 }
  0x6c   :  { %1417 = vmatpush1.bf16.msra.mxu0 %v1816_v2 }
  0x6d   :  { %1754 = vmatprep.subr.msk.bf16.mxu0 %vm1753_vm5, %v1815_v1  ;;  %vm1763_vm5 = vmpackc.low %vm344_vm4, %vm340_vm3 }
  0x70   :  { %1419 = vmatpush1.bf16.msra.mxu0 %v1816_v2 }
  0x71   :  { %1756 = vmatprep.subr.msk.bf16.mxu0 %vm1755_vm8, %v1815_v1  ;;  %vm1616_vm8 = vcmask 0  }
  0x74   :  { %1421 = vmatpush1.bf16.msra.mxu0 %v1816_v2 }
  0x75   :  { %1758 = vmatprep.subr.msk.bf16.mxu0 %vm1757_vm11, %v1815_v1 }
  0x78   :  { %1423 = vmatpush1.bf16.msra.mxu0 %v1816_v2 }
  0x79   :  { %1760 = vmatprep.subr.msk.bf16.mxu0 %vm1759_vm15, %v1815_v1 }
  0x7c   :  { %1425 = vmatpush1.bf16.msra.mxu0 %v1816_v2 }
  0x7d   :  { %1762 = vmatprep.subr.msk.bf16.mxu0 %vm1761_vm2, %v1815_v1 }
  0x80   :  { %1427 = vmatpush1.bf16.msra.mxu0 %v1816_v2 }
  0x81   :  { %1764 = vmatprep.subr.msk.bf16.mxu0 %vm1763_vm5, %v1815_v1 }
  0x84   :  { %1429 = vmatpush1.bf16.msra.mxu0 %v1816_v2  ;;  %v1696_v2 = vadd.f32 -1.0, %v1482_v35 }
  0x87   :  { %1431 = vmatmul.mubr.bf16.vlgmr.msra.gmra.mrb[4].mxu0 %v1891_v24  ;;  %v1697_v24 = vadd.f32 -1.0, %v1483_v36 }
  0x98   :  { %v2116_v33 = vpop.permute.xlu0 %1441 }
  0x9c   :  { %v2122_v1 = vpop.permute.xlu0 %1488 }
  0x9d   :  { %v1495_v41 = vadd.f32 %v2122_v1, %v1482_v35  ;;  %v1496_v46 = vadd.f32 %v2122_v1, %v1483_v36  ;;  %v1527_v49 = vadd.f32 %v1696_v2, %v2122_v1  ;;  %v1528_v51 = vadd.f32 %v1697_v24, %v2122_v1 }
  0xe5   :  { %v1350_v3 = vpop.f32.mrb[0].mxu1 }
  0xe6   :  { %v1352_v28 = vpop.f32.mrb[1].mxu1 }
  0xe7   :  { %v1354_v29 = vpop.f32.mrb[2].mxu1 }
  0xe8   :  { %v1355_v30 = vpop.f32.mrb[3].mxu1  ;;  %v1122_v29 = vunpack.c.h.bf16 %v1874_v16 }
 0x11a   :  { %v1309_v38 = vpop.f32.mrb[0].mxu0 }
 0x11b   :  { %v1351_v39 = vadd.f32 %v1350_v3, %v1309_v38  ;;  %v1311_v40 = vpop.f32.mrb[1].mxu0  ;;  %v1481_v3 = vadd.s32 1, %v2058_v11  ;;  %v1451_v38 = vcombine.high %v1122_v29, %v1122_v29 }
 0x11c   :  { %v1353_v43 = vadd.f32 %v1352_v28, %v1311_v40  ;;  %v1313_v32 = vpop.f32.mrb[2].mxu0  ;;  %v1484_v28 = vcvt.s32.f32 %v1480_v27 }
 0x11d   :  { %v1444_v47 = vadd.f32 %v2116_v33, %v1351_v39  ;;  %v1314_v48 = vpop.f32.mrb[3].mxu0  ;;  %v1485_v30 = vcvt.s32.f32 %v1481_v3 }
 0x11e   :  { %v1445_v50 = vadd.f32 %v2116_v33, %v1353_v43  ;;  %v1698_v35 = vadd.f32 -1.0, %v1484_v28  ;;  %v1497_v40 = vadd.f32 %v2122_v1, %v1484_v28 }
 0x11f   :  { %v1515_v52 = vsub.f32 %v1444_v47, %v2120_v37  ;;  %v1499_v53 = vsub.f32 %v1495_v41, %v1444_v47  ;;  %v1491_v62 = vsub.f32 %v2122_v1, %v1444_v47  ;;  %v1699_v24 = vadd.f32 -1.0, %v1485_v30 }
 0x120   :  { %v1516_v55 = vsub.f32 %v1445_v50, %v2127_v44  ;;  %v1500_v56 = vsub.f32 %v1496_v46, %v1445_v50  ;;  %v1492_v63 = vsub.f32 %v2122_v1, %v1445_v50  ;;  %v1498_v11 = vadd.f32 %v2122_v1, %v1485_v30 }
 0x121   :  { %1773 = vrcp.f32 %v1499_v53  ;;  %v1531_v57 = vsub.f32 %v1527_v49, %v1515_v52  ;;  %v1519_v0 = vsub.f32 %v2122_v1, %v1515_v52  ;;  %v1529_v32 = vadd.f32 %v1698_v35, %v2122_v1 }
 0x122   :  { %1775 = vrcp.f32 %v1500_v56  ;;  %v1532_v58 = vsub.f32 %v1528_v51, %v1516_v55  ;;  %v1520_v9 = vsub.f32 %v2122_v1, %v1516_v55  ;;  %v1530_v48 = vadd.f32 %v1699_v24, %v2122_v1  ;;  %v1563_v24 = vld [vmem:[#allocation4] sm:$0xf] }
 0x123   :  { %v1539_v59 = vsel %vm1535_vm6, 1.0, %v1531_v57  ;;  %v1460_v30 = vsel %vm1454_vm7, %v1451_v38, 0.0 }
 0x124   :  { %1777 = vrcp.f32 %v1539_v59 }
 0x125   :  { %1779 = vrcp.f32 %v1532_v58  ;;  %v1391_v6 = vpop.f32.mrb[4].mxu1 }
 0x126   :  { %v1393_v12 = vpop.f32.mrb[5].mxu1 }
 0x127   :  { %v1395_v14 = vpop.f32.mrb[6].mxu1 }
 0x128   :  { %v1396_v17 = vpop.f32.mrb[7].mxu1 }
 0x129   :  { %v1456_v17 = vsel %vm1454_vm7, %v2127_v44, 0.0 }
 0x12b   :  { %v1774_v60 = vpop.eup %1773 }
 0x12c   :  { %v1776_v61 = vpop.eup %1775  ;;  %v1504_v7 = vmul.f32 %v1774_v60, %v1491_v62 }
 0x12d   :  { %v1506_v8 = vmul.f32 %v1776_v61, %v1492_v63 }
 0x12e   :  { %v1778_v5 = vpop.eup %1777  ;;  %v1511_v19 = vsub.f32 1.0, %v1504_v7  ;;  %v1117_v7 = vld [vmem:[%s2193_s0 + $0x8] sm:$0xff] }
 0x12f   :  { %v1780_v10 = vpop.eup %1779  ;;  %v1544_v13 = vmul.f32 %v1778_v5, %v1519_v0  ;;  %v1512_v20 = vsub.f32 1.0, %v1506_v8  ;;  %v1119_v14 = vsub.f32 0.0, %v1117_v7 }
 0x130   :  { %v1546_v15 = vmul.f32 %v1780_v10, %v1520_v9 }
 0x131   :  { %v1551_v18 = vsub.f32 1.0, %v1544_v13 }
 0x132   :  { %v1552_v21 = vsub.f32 1.0, %v1546_v15 }
 0x133   :  { %v1555_v22 = vsel %vm1535_vm6, 0.0, %v1551_v18 }
 0x134   :  { %v1559_v23 = vsub.f32 %v1511_v19, %v1555_v22  ;;  %v1560_v25 = vsub.f32 %v1512_v20, %v1552_v21 }
 0x136   :  { %v1568_v26 = vcombine.low %v1559_v23, %v1560_v25  ;;  %v1458_v23 = vsel %vm1454_vm7, %v1122_v29, 0.0 }
 0x15a   :  { %v1432_v31 = vpop.f32.mrb[4].mxu0 }
 0x15b   :  { %v1433_v34 = vadd.f32 %v1432_v31, %v1391_v6  ;;  %v1434_v36 = vpop.f32.mrb[5].mxu0 }
 0x15c   :  { %v1435_v2 = vadd.f32 %v1434_v36, %v1393_v12  ;;  %v1436_v4 = vpop.f32.mrb[6].mxu0 }
 0x15d   :  { %v1446_v39 = vadd.f32 %v2116_v33, %v1433_v34  ;;  %v1437_v41 = vpop.f32.mrb[7].mxu0  ;;  %v1606_v34 = vsel %vm1113_vm13, %v1946_v42, 0.0 }
 0x15e   :  { %v1447_v54 = vadd.f32 %v2116_v33, %v1435_v2  ;;  %v1116_v33 = vld [vmem:[%s2193_s0] sm:$0xff]  ;;  %v1607_v35 = vrot.slane %v1606_v34, 4  ;;  %s1820_s0 = smov [#allocation5]  }
 0x15f   :  { %v1501_v43 = vsub.f32 %v1497_v40, %v1446_v39  ;;  %v1517_v16 = vsub.f32 %v1446_v39, %v1122_v29  ;;  %v1118_v51 = vsub.f32 0.0, %v1116_v33  ;;  %v1493_v52 = vsub.f32 %v2122_v1, %v1446_v39  ;;  %s1624_s18 = sshll.u32 %s1820_s0, 4  ;;  %s1625_s18 = int_to_ptr.vmem [resolvable:$true] %s1624_s18 }
 0x160   :  { %v1502_v46 = vsub.f32 %v1498_v11, %v1447_v54  ;;  %v1518_v47 = vsub.f32 %v1447_v54, %v1451_v38  ;;  %v1494_v55 = vsub.f32 %v2122_v1, %v1447_v54  ;;  %v1608_v36 = vadd.f32 %v1607_v35, %v1606_v34  ;;  %s1791_s19 = scalar_lea.vmem %s1625_s18, 16  ;;  %s1795_s20 = scalar_lea.vmem %s1625_s18, 32 }
 0x161   :  { %1781 = vrcp.f32 %v1501_v43  ;;  %v1533_v49 = vsub.f32 %v1529_v32, %v1517_v16  ;;  %v1521_v58 = vsub.f32 %v2122_v1, %v1517_v16  ;;  %v1572_v62 = vmul.f32 %v1568_v26, %v1118_v51  ;;  %p1792_p0 = scmp.ne.s32.totalorder %s1625_s18, %s1791_s19  ;;  %p1796_p1 = scmp.lt.s32.totalorder %s1625_s18, %s1625_s18 }
 0x162   :  { %1783 = vrcp.f32 %v1502_v46  ;;  %v1534_v50 = vsub.f32 %v1530_v48, %v1518_v47  ;;  %v1522_v61 = vsub.f32 %v2122_v1, %v1518_v47  ;;  %v1455_v1 = vsel %vm1454_vm7, %v2120_v37, 0.0  ;;  %p1797_p2 = scmp.lt.s32.totalorder %s1795_s20, %s1791_s19 }
 0x163   :  { %1785 = vrcp.f32 %v1533_v49  ;;  %v1576_v12 = vcombine.high %v1572_v62, %v1572_v62  ;;  %v1457_v20 = vadd.f32 %v1456_v17, %v1455_v1  ;;  %v1580_v22 = vsel %vm1454_vm7, %v1572_v62, 0.0 }
 0x164   :  { %1787 = vrcp.f32 %v1534_v50  ;;  %v1609_v29 = vrot.slane %v1608_v36, 2  ;;  %p1798_p3 = por %p1797_p2, %p1796_p1 }
 0x165   :  { %v1581_v19 = vsel %vm1454_vm7, %v1576_v12, 0.0  ;;  %v1459_v28 = vadd.f32 %v1458_v23, %v1457_v20 }
 0x166   :  { %v1582_v25 = vadd.f32 %v1581_v19, %v1580_v22  ;;  %v1610_v2 = vadd.f32 %v1609_v29, %v1608_v36  ;;  %p1799_p4 = pnand %p1798_p3, %p1792_p0 }
 0x167   :  { %v1461_v31 = vadd.f32 %v1460_v30, %v1459_v28 }
 0x168   :  { %v1611_v39 = vrot.slane %v1610_v2, 1 }
 0x16a   :  { %v1612_v54 = vadd.f32 %v1611_v39, %v1610_v2 }
 0x16b   :  { %v1782_v53 = vpop.eup %1781 }
 0x16c   :  { %v1784_v56 = vpop.eup %1783  ;;  %v1508_v57 = vmul.f32 %v1782_v53, %v1493_v52  ;;  %v1613_v11 = vmax.f32 %v1612_v54, 1.0 }
 0x16d   :  { %v1786_v59 = vpop.eup %1785  ;;  %v1510_v60 = vmul.f32 %v1784_v56, %v1494_v55 }
 0x16e   :  { %v1788_v63 = vpop.eup %1787  ;;  %v1548_v0 = vmul.f32 %v1786_v59, %v1521_v58  ;;  %v1513_v6 = vsub.f32 1.0, %v1508_v57  ;;  %1789 = vrcp.f32 %v1613_v11 }
 0x16f   :  { %v1550_v5 = vmul.f32 %v1788_v63, %v1522_v61  ;;  %v1514_v9 = vsub.f32 1.0, %v1510_v60 }
 0x170   :  { %v1553_v8 = vsub.f32 1.0, %v1548_v0 }
 0x171   :  { %v1554_v10 = vsub.f32 1.0, %v1550_v5 }
 0x172   :  { %v1561_v13 = vsub.f32 %v1513_v6, %v1553_v8 }
 0x173   :  { %v1562_v15 = vsub.f32 %v1514_v9, %v1554_v10 }
 0x175   :  { %v1569_v18 = vcombine.low %v1561_v13, %v1562_v15 }
 0x177   :  { %v1573_v21 = vmul.f32 %v1569_v18, %v1119_v14 }
 0x178   :  { %v1790_v33 = vpop.eup %1789 }
 0x179   :  { %v1577_v26 = vcombine.high %v1573_v21, %v1573_v21  ;;  %v1583_v27 = vsel %vm1454_vm7, %v1573_v21, 0.0 }
 0x17a   :  { %v1584_v3 = vadd.f32 %v1583_v27, %v1582_v25 }
 0x17b   :  { %v1585_v37 = vsel %vm1454_vm7, %v1577_v26, 0.0 }
 0x17c   :  { %v1586_v44 = vadd.f32 %v1585_v37, %v1584_v3 }
 0x17e   :  { %1587 = vadd.xlane.f32.xlu1 %v1586_v44 }
 0x182   :  { %1462 = vadd.xlane.f32.xlu1 %v1461_v31 }
 0x20b   :  { %v1588_v4 = vpop.xlane.xlu1 %1587 }
 0x20c   :  { %v1589_v40 = vadd.f32 %v1588_v4, %v1563_v24 }
 0x20e   :  { %1590 = vst.msk [vmem:[#allocation4] sm:$0xf] %vm1113_vm13, %v1589_v40 }
 0x20f   :  { %v1463_v41 = vpop.xlane.xlu1 %1462 }
 0x210   :  { %v1464_v38 = vadd.f32 %v1463_v41, %v1960_v45 }
 0x212   :  { %1466 = vst.msk [vmem:[#allocation3] sm:$0xf] %vm1113_vm13, %v1464_v38 }
 0x215   :  { %v1597_v43 = vld [vmem:[#allocation4] sm:$0xf] }
 0x216   :  { %v1598_v16 = vmul.f32 %v1946_v42, %v1597_v43 }
 0x218   :  { %v1599_v32 = vsel %vm1113_vm13, %v1598_v16, 0.0 }
 0x219   :  { %v1600_v46 = vrot.slane %v1599_v32, 4 }
 0x21b   :  { %v1601_v47 = vadd.f32 %v1600_v46, %v1599_v32 }
 0x21d   :  { %v1602_v48 = vrot.slane %v1601_v47, 2 }
 0x21f   :  { %v1603_v49 = vadd.f32 %v1602_v48, %v1601_v47 }
 0x221   :  { %v1604_v50 = vrot.slane %v1603_v49, 1 }
 0x223   :  { %v1605_v51 = vadd.f32 %v1604_v50, %v1603_v49 }
 0x225   :  { %v1615_v45 = vmul.f32 %v1790_v33, %v1605_v51 }
 0x227   :  { %1617 = vst.msk [vmem:[#allocation5] sm:$0x1] %vm1616_vm8, %v1615_v45 }
 0x228   :  { %1802 = shalt.err (!%p1799_p4)
}
 0x229   :  { %s1803_s23 = scalar_lea.hbm %s2196_s3, 16 }
 0x22a   :  { %p1804_p5 = scmp.ne.s32.totalorder %s2196_s3, %s1803_s23  ;;  %p1807_p6 = scmp.lt.u32.totalorder %s1803_s23, %s2196_s3 }
 0x22c   :  { %p1809_p7 = pnand %p1807_p6, %p1804_p5 }
 0x22e   :  { %1812 = shalt.err (!%p1809_p7)
}
 0x22f   :  { %1627 = dma.vmem_to_hbm [thread:$0]  %s1625_s18, 16, %s2196_s3, [#allocation6]  }
 0x230   :  { %1813 = dma.done.wait [#allocation6], 16  }
 0x231   :  { %1814 = vsyncadd [#allocation6], 4294967280 }
 0x232   :  { %1631 = vsyncpa [#allocation6], 1 }

</bundles_post_ra>
